<compile_context>
chip_gen: v7x
topology: tpu7x:2x2x1
jax: 0.10.0
libtpu: 0.0.40
codegen_flags: <defaults>
</compile_context>

<pallas_src>
import jax
import jax.numpy as jnp
from jax.experimental import pallas as pl
from jax.experimental.pallas import tpu as pltpu

# ---- scaled-down ModelArgs (ratios preserved: rotary_emb_dim == head_size) ----
N_EMBD = 32
N_HEAD = 4
HEAD_SIZE = N_EMBD // N_HEAD          # 8
ROT_DIM = HEAD_SIZE                   # original: 192 == 768 // 4


# --------------------------- rotary glue (wrapper-side constants) -------------

def _rope_tables(T, rot_dim):
    """lucidrains interleaved convention: freqs repeated [f0,f0,f1,f1,...]."""
    inv_freq = 1.0 / (10000.0 ** (jnp.arange(0, rot_dim, 2, dtype=jnp.float32)
                                  / rot_dim))
    freqs = jnp.outer(jnp.arange(T, dtype=jnp.float32), inv_freq)   # (T, rot/2)
    freqs = jnp.repeat(freqs, 2, axis=-1)                           # (T, rot)
    return jnp.cos(freqs), jnp.sin(freqs)


def _extended_cos_sin(T):
    """(T, C) cos/sin tables; positions past rot_dim within a head get
    cos=1 / sin=0 so non-rotary dims pass through unchanged."""
    cos_r, sin_r = _rope_tables(T, ROT_DIM)
    pad = HEAD_SIZE - ROT_DIM
    if pad:
        cos_h = jnp.concatenate([cos_r, jnp.ones((T, pad), jnp.float32)], -1)
        sin_h = jnp.concatenate([sin_r, jnp.zeros((T, pad), jnp.float32)], -1)
    else:
        cos_h, sin_h = cos_r, sin_r
    return jnp.tile(cos_h, (1, N_HEAD)), jnp.tile(sin_h, (1, N_HEAD))


def _make_rotate_half_matrix(C, head_size, rot_dim):
    """Block-diagonal signed permutation R (C,C) so that x @ R equals the
    interleaved rotate_half of x on the first rot_dim dims of every head
    ((x0,x1)->(-x1,x0)), and 0 elsewhere (sin is 0 there anyway)."""
    i = jnp.arange(C)[:, None]
    j = jnp.arange(C)[None, :]
    same_head = (i // head_size) == (j // head_size)
    di, dj = i % head_size, j % head_size
    in_rot = same_head & (di < rot_dim) & (dj < rot_dim)
    r = jnp.where(in_rot & (dj % 2 == 0) & (di == dj + 1), -1.0, 0.0) + \
        jnp.where(in_rot & (dj % 2 == 1) & (di == dj - 1), 1.0, 0.0)
    return r.astype(jnp.float32)


# --------------------------- fused MHA kernel ---------------------------------

def _mha_kernel(x_ref, w5_ref, cos_ref, sin_ref, wproj_ref, bproj_ref, o_ref):
    C = N_EMBD
    H, hs = N_HEAD, HEAD_SIZE

    x = x_ref[...]                                   # (T, C) bf16
    T = x.shape[0]

    # one wide fused projection on the MXU: [q | k | v | qR | kR] = x @ W5
    qkv = jnp.dot(x, w5_ref[...], preferred_element_type=jnp.float32)  # (T, 5C)

    # rotary is now pure VPU elementwise (rotate-half folded into W5).
    cos = cos_ref[...]
    sin = sin_ref[...]
    q = qkv[:, 0:C] * cos + qkv[:, 3 * C:4 * C] * sin
    k = qkv[:, C:2 * C] * cos + qkv[:, 4 * C:5 * C] * sin
    v = qkv[:, 2 * C:3 * C]

    # fold the attention scale into q; cast whole slabs to bf16 ONCE (hoisted
    # out of the head loop so per-head slices are plain bf16 lane slices).
    q_bf = (q * (hs ** -0.5)).astype(jnp.bfloat16)
    k_bf = k.astype(jnp.bfloat16)
    v_bf = v.astype(jnp.bfloat16)

    row = jax.lax.broadcasted_iota(jnp.int32, (T, T), 0)
    col = jax.lax.broadcasted_iota(jnp.int32, (T, T), 1)
    causal = col <= row

    wproj = wproj_ref[...]                           # (C, C) bf16
    y = jnp.broadcast_to(bproj_ref[...], (T, C)).astype(jnp.float32)

    # all heads handled inside one grid step (H=4 at toy scale).
    # TODO(synk): at real T/C move heads onto a grid axis / fori_loop to bound
    # vreg live ranges and give v7x's two TensorCores finer-grained work.
    for h in range(H):
        sl = slice(h * hs, (h + 1) * hs)

        # scores = q_h @ k_h^T (contract on the head dim, no transpose op)
        s = jax.lax.dot_general(q_bf[:, sl], k_bf[:, sl],
                                (((1,), (1,)), ((), ())),
                                preferred_element_type=jnp.float32)    # (T, T)
        s = jnp.where(causal, s, -1e30)              # finite mask -> no NaN risk
        m = jnp.max(s, axis=-1, keepdims=True)
        p = jnp.exp(s - m)
        l = jnp.sum(p, axis=-1, keepdims=True)
        p = p * pl.reciprocal(l, approx=True)        # EUP slot, off the VPU path

        o_h = jnp.dot(p.astype(jnp.bfloat16), v_bf[:, sl],
                      preferred_element_type=jnp.float32)              # (T, hs)

        # head-sliced projection: sum_h o_h @ Wproj[h*hs:(h+1)*hs, :]
        #   == concat(heads, -1) @ Wproj   (no in-kernel concat needed)
        y = y + jnp.dot(o_h.astype(jnp.bfloat16), wproj[sl, :],
                        preferred_element_type=jnp.float32)

    o_ref[...] = y.astype(o_ref.dtype)               # dropout: identity


# --------------------------- wrapper ------------------------------------------

@jax.jit
def multi_head_attention(x, wq, wk, wv, w_proj, b_proj):
    """x: (B, T, C) f32; wq/wk/wv/w_proj: (C, C); b_proj: (C,)."""
    B, T, C = x.shape
    cos, sin = _extended_cos_sin(T)                          # (T, C) f32
    R = _make_rotate_half_matrix(C, HEAD_SIZE, ROT_DIM)      # (C, C) f32

    # fold rotate-half into the projection weights: (C, 5C) fused bf16 weight.
    w5 = jnp.concatenate([wq, wk, wv, wq @ R, wk @ R], axis=1).astype(jnp.bfloat16)
    x_bf = x.astype(jnp.bfloat16)                            # halve streamed bytes

    return pl.pallas_call(
        _mha_kernel,
        out_shape=jax.ShapeDtypeStruct((B, T, C), jnp.float32),
        grid=(B,),
        in_specs=[
            pl.BlockSpec((None, T, C), lambda b: (b, 0, 0)),   # x  (per-batch, bf16)
            pl.BlockSpec((C, 5 * C),   lambda b: (0, 0)),      # [Wq|Wk|Wv|WqR|WkR]
            pl.BlockSpec((T, C),       lambda b: (0, 0)),      # cos (extended)
            pl.BlockSpec((T, C),       lambda b: (0, 0)),      # sin (extended)
            pl.BlockSpec((C, C),       lambda b: (0, 0)),      # Wproj
            pl.BlockSpec((1, C),       lambda b: (0, 0)),      # proj bias
        ],
        out_specs=pl.BlockSpec((None, T, C), lambda b: (b, 0, 0)),
        compiler_params=pltpu.CompilerParams(
            dimension_semantics=("parallel",)),
    )(x_bf, w5, cos, sin, w_proj.astype(jnp.bfloat16), b_proj.reshape(1, C))


# --------------------------- pure-JAX reference (f32) -------------------------

def _rotate_half_interleaved(t):
    t1 = t[..., 0::2]
    t2 = t[..., 1::2]
    return jnp.stack([-t2, t1], axis=-1).reshape(t.shape)


def mha_reference(x, wq, wk, wv, w_proj, b_proj):
    B, T, C = x.shape
    H, hs = N_HEAD, HEAD_SIZE
    q = (x @ wq).reshape(B, T, H, hs)
    k = (x @ wk).reshape(B, T, H, hs)
    v = (x @ wv).reshape(B, T, H, hs)
    cos, sin = _rope_tables(T, ROT_DIM)                  # (T, rot_dim)
    cos = cos[None, :, None, :]
    sin = sin[None, :, None, :]

    def rope(t):
        rot = t[..., :ROT_DIM]
        rot = rot * cos + _rotate_half_interleaved(rot) * sin
        if ROT_DIM < hs:
            return jnp.concatenate([rot, t[..., ROT_DIM:]], axis=-1)
        return rot

    q = rope(q)
    k = rope(k)
    s = jnp.einsum('bqhd,bkhd->bhqk', q, k) * hs ** (-0.5)
    mask = jnp.tril(jnp.ones((T, T), bool))
    s = jnp.where(mask[None, None], s, -jnp.inf)
    p = jax.nn.softmax(s, axis=-1)
    o = jnp.einsum('bhqk,bkhd->bqhd', p, v).reshape(B, T, C)
    return o @ w_proj + b_proj


# --------------------------- main ----------------------------------------------

if __name__ == "__main__":
    key = jax.random.PRNGKey(0)
    kx, kq, kk, kv, kp, kb = jax.random.split(key, 6)

    B, T = 2, 8
    x = jax.random.normal(kx, (B, T, N_EMBD), jnp.float32)
    # per-head q/k/v weights stacked along output columns (bias=False in spec)
    wq = 0.02 * jax.random.normal(kq, (N_EMBD, N_EMBD), jnp.float32)
    wk = 0.02 * jax.random.normal(kk, (N_EMBD, N_EMBD), jnp.float32)
    wv = 0.02 * jax.random.normal(kv, (N_EMBD, N_EMBD), jnp.float32)
    w_proj = 0.02 * jax.random.normal(kp, (N_EMBD, N_EMBD), jnp.float32)
    b_proj = 0.02 * jax.random.normal(kb, (N_EMBD,), jnp.float32)

    out = multi_head_attention(x, wq, wk, wv, w_proj, b_proj)
    jax.block_until_ready(out)

    assert out.shape == (B, T, N_EMBD) and out.dtype == jnp.float32
    ref = mha_reference(x, wq, wk, wv, w_proj, b_proj)
    assert jnp.allclose(out, ref, atol=1e-2, rtol=1e-1), (
        f"max abs err {float(jnp.max(jnp.abs(out - ref)))}")
    print("KERNEL_OK")
</pallas_src>

<mosaic_0001>
module attributes {stable_mosaic.version = 11 : i64} {
  func.func @_mha_kernel(%arg0: i32, %arg1: memref<1x8x32xbf16, #tpu.memory_space<vmem>>, %arg2: memref<32x160xbf16, #tpu.memory_space<vmem>>, %arg3: memref<8x32xf32, #tpu.memory_space<vmem>>, %arg4: memref<8x32xf32, #tpu.memory_space<vmem>>, %arg5: memref<32x32xbf16, #tpu.memory_space<vmem>>, %arg6: memref<1x32xf32, #tpu.memory_space<vmem>>, %arg7: memref<1x8x32xf32, #tpu.memory_space<vmem>>) attributes {dimension_semantics = [#tpu.dimension_semantics<parallel>], iteration_bounds = array<i64: 2>, scalar_prefetch = 0 : i64, scratch_operands = 0 : i64, tpu.core_type = #tpu.core_type<tc>, window_params = [{transform_indices = @transform_0, window_bounds = array<i64: 1, 8, 32>}, {pipeline_mode = #tpu.pipeline_mode<synchronous>, transform_indices = @transform_1, window_bounds = array<i64: 32, 160>}, {pipeline_mode = #tpu.pipeline_mode<synchronous>, transform_indices = @transform_2, window_bounds = array<i64: 8, 32>}, {pipeline_mode = #tpu.pipeline_mode<synchronous>, transform_indices = @transform_3, window_bounds = array<i64: 8, 32>}, {pipeline_mode = #tpu.pipeline_mode<synchronous>, transform_indices = @transform_4, window_bounds = array<i64: 32, 32>}, {pipeline_mode = #tpu.pipeline_mode<synchronous>, transform_indices = @transform_5, window_bounds = array<i64: 1, 32>}, {transform_indices = @transform_6, window_bounds = array<i64: 1, 8, 32>}]} {
    %c0 = arith.constant 0 : index
    %c0_0 = arith.constant 0 : index
    %c0_1 = arith.constant 0 : index
    %0 = vector.load %arg1[%c0, %c0_0, %c0_1] : memref<1x8x32xbf16, #tpu.memory_space<vmem>>, vector<1x8x32xbf16>
    %1 = vector.shape_cast %0 : vector<1x8x32xbf16> to vector<8x32xbf16>
    %c0_2 = arith.constant 0 : index
    %c0_3 = arith.constant 0 : index
    %2 = vector.load %arg2[%c0_2, %c0_3] : memref<32x160xbf16, #tpu.memory_space<vmem>>, vector<32x160xbf16>
    %cst = arith.constant dense<0.000000e+00> : vector<8x160xf32>
    %3 = tpu.matmul %1, %2, %cst {dimension_numbers = #tpu.dot_dimension_numbers<[1], [0], [0], [1], [0, 0, 1, 1], [], []>} : vector<8x32xbf16>, vector<32x160xbf16>, vector<8x160xf32> -> vector<8x160xf32>
    %c0_4 = arith.constant 0 : index
    %c0_5 = arith.constant 0 : index
    %4 = vector.load %arg3[%c0_4, %c0_5] : memref<8x32xf32, #tpu.memory_space<vmem>>, vector<8x32xf32>
    %c0_6 = arith.constant 0 : index
    %c0_7 = arith.constant 0 : index
    %5 = vector.load %arg4[%c0_6, %c0_7] : memref<8x32xf32, #tpu.memory_space<vmem>>, vector<8x32xf32>
    %6 = vector.extract_strided_slice %3 {offsets = [0, 0], sizes = [8, 32], strides = [1, 1]} : vector<8x160xf32> to vector<8x32xf32>
    %7 = arith.mulf %6, %4 : vector<8x32xf32>
    %8 = vector.extract_strided_slice %3 {offsets = [0, 96], sizes = [8, 32], strides = [1, 1]} : vector<8x160xf32> to vector<8x32xf32>
    %9 = arith.mulf %8, %5 : vector<8x32xf32>
    %10 = arith.addf %7, %9 : vector<8x32xf32>
    %11 = vector.extract_strided_slice %3 {offsets = [0, 32], sizes = [8, 32], strides = [1, 1]} : vector<8x160xf32> to vector<8x32xf32>
    %12 = arith.mulf %11, %4 : vector<8x32xf32>
    %13 = vector.extract_strided_slice %3 {offsets = [0, 128], sizes = [8, 32], strides = [1, 1]} : vector<8x160xf32> to vector<8x32xf32>
    %14 = arith.mulf %13, %5 : vector<8x32xf32>
    %15 = arith.addf %12, %14 : vector<8x32xf32>
    %16 = vector.extract_strided_slice %3 {offsets = [0, 64], sizes = [8, 32], strides = [1, 1]} : vector<8x160xf32> to vector<8x32xf32>
    %cst_8 = arith.constant 0.353553385 : f32
    %17 = vector.broadcast %cst_8 : f32 to vector<8x32xf32>
    %18 = arith.mulf %10, %17 : vector<8x32xf32>
    %19 = arith.truncf %18 : vector<8x32xf32> to vector<8x32xbf16>
    %20 = arith.truncf %15 : vector<8x32xf32> to vector<8x32xbf16>
    %21 = arith.truncf %16 : vector<8x32xf32> to vector<8x32xbf16>
    %22 = tpu.iota {dimensions = array<i32: 0>} : vector<8x8xi32>
    %23 = tpu.iota {dimensions = array<i32: 1>} : vector<8x8xi32>
    %24 = arith.cmpi sle, %23, %22 : vector<8x8xi32>
    %c0_9 = arith.constant 0 : index
    %c0_10 = arith.constant 0 : index
    %25 = vector.load %arg5[%c0_9, %c0_10] : memref<32x32xbf16, #tpu.memory_space<vmem>>, vector<32x32xbf16>
    %c0_11 = arith.constant 0 : index
    %c0_12 = arith.constant 0 : index
    %26 = vector.load %arg6[%c0_11, %c0_12] : memref<1x32xf32, #tpu.memory_space<vmem>>, vector<1x32xf32>
    %27 = vector.shape_cast %26 : vector<1x32xf32> to vector<1x32xf32>
    %28 = vector.broadcast %27 : vector<1x32xf32> to vector<8x32xf32>
    %29 = vector.extract_strided_slice %19 {offsets = [0, 0], sizes = [8, 8], strides = [1, 1]} : vector<8x32xbf16> to vector<8x8xbf16>
    %30 = vector.extract_strided_slice %20 {offsets = [0, 0], sizes = [8, 8], strides = [1, 1]} : vector<8x32xbf16> to vector<8x8xbf16>
    %cst_13 = arith.constant dense<0.000000e+00> : vector<8x8xf32>
    %31 = tpu.matmul %29, %30, %cst_13 {dimension_numbers = #tpu.dot_dimension_numbers<[1], [1], [0], [0], [0, 0, 1, 0], [], []>} : vector<8x8xbf16>, vector<8x8xbf16>, vector<8x8xf32> -> vector<8x8xf32>
    %cst_14 = arith.constant -1.000000e+30 : f32
    %32 = vector.broadcast %cst_14 : f32 to vector<8x8xf32>
    %33 = arith.select %24, %31, %32 : vector<8x8xi1>, vector<8x8xf32>
    %cst_15 = arith.constant dense<0xFF800000> : vector<8xf32>
    %34 = vector.multi_reduction <maximumf>, %33, %cst_15 [1] : vector<8x8xf32> to vector<8xf32>
    %35 = vector.shape_cast %34 : vector<8xf32> to vector<8x1xf32>
    %36 = vector.broadcast %35 : vector<8x1xf32> to vector<8x8xf32>
    %37 = arith.subf %33, %36 : vector<8x8xf32>
    %38 = math.exp %37 : vector<8x8xf32>
    %cst_16 = arith.constant dense<0.000000e+00> : vector<8xf32>
    %39 = vector.multi_reduction <add>, %38, %cst_16 [1] : vector<8x8xf32> to vector<8xf32>
    %40 = vector.shape_cast %39 : vector<8xf32> to vector<8x1xf32>
    %41 = tpu.reciprocal %40 {approx = true} : vector<8x1xf32> -> vector<8x1xf32>
    %42 = vector.broadcast %41 : vector<8x1xf32> to vector<8x8xf32>
    %43 = arith.mulf %38, %42 : vector<8x8xf32>
    %44 = arith.truncf %43 : vector<8x8xf32> to vector<8x8xbf16>
    %45 = vector.extract_strided_slice %21 {offsets = [0, 0], sizes = [8, 8], strides = [1, 1]} : vector<8x32xbf16> to vector<8x8xbf16>
    %cst_17 = arith.constant dense<0.000000e+00> : vector<8x8xf32>
    %46 = tpu.matmul %44, %45, %cst_17 {dimension_numbers = #tpu.dot_dimension_numbers<[1], [0], [0], [1], [0, 0, 1, 1], [], []>} : vector<8x8xbf16>, vector<8x8xbf16>, vector<8x8xf32> -> vector<8x8xf32>
    %47 = arith.truncf %46 : vector<8x8xf32> to vector<8x8xbf16>
    %48 = vector.extract_strided_slice %25 {offsets = [0, 0], sizes = [8, 32], strides = [1, 1]} : vector<32x32xbf16> to vector<8x32xbf16>
    %cst_18 = arith.constant dense<0.000000e+00> : vector<8x32xf32>
    %49 = tpu.matmul %47, %48, %cst_18 {dimension_numbers = #tpu.dot_dimension_numbers<[1], [0], [0], [1], [0, 0, 1, 1], [], []>} : vector<8x8xbf16>, vector<8x32xbf16>, vector<8x32xf32> -> vector<8x32xf32>
    %50 = arith.addf %28, %49 : vector<8x32xf32>
    %51 = vector.extract_strided_slice %19 {offsets = [0, 8], sizes = [8, 8], strides = [1, 1]} : vector<8x32xbf16> to vector<8x8xbf16>
    %52 = vector.extract_strided_slice %20 {offsets = [0, 8], sizes = [8, 8], strides = [1, 1]} : vector<8x32xbf16> to vector<8x8xbf16>
    %cst_19 = arith.constant dense<0.000000e+00> : vector<8x8xf32>
    %53 = tpu.matmul %51, %52, %cst_19 {dimension_numbers = #tpu.dot_dimension_numbers<[1], [1], [0], [0], [0, 0, 1, 0], [], []>} : vector<8x8xbf16>, vector<8x8xbf16>, vector<8x8xf32> -> vector<8x8xf32>
    %cst_20 = arith.constant -1.000000e+30 : f32
    %54 = vector.broadcast %cst_20 : f32 to vector<8x8xf32>
    %55 = arith.select %24, %53, %54 : vector<8x8xi1>, vector<8x8xf32>
    %cst_21 = arith.constant dense<0xFF800000> : vector<8xf32>
    %56 = vector.multi_reduction <maximumf>, %55, %cst_21 [1] : vector<8x8xf32> to vector<8xf32>
    %57 = vector.shape_cast %56 : vector<8xf32> to vector<8x1xf32>
    %58 = vector.broadcast %57 : vector<8x1xf32> to vector<8x8xf32>
    %59 = arith.subf %55, %58 : vector<8x8xf32>
    %60 = math.exp %59 : vector<8x8xf32>
    %cst_22 = arith.constant dense<0.000000e+00> : vector<8xf32>
    %61 = vector.multi_reduction <add>, %60, %cst_22 [1] : vector<8x8xf32> to vector<8xf32>
    %62 = vector.shape_cast %61 : vector<8xf32> to vector<8x1xf32>
    %63 = tpu.reciprocal %62 {approx = true} : vector<8x1xf32> -> vector<8x1xf32>
    %64 = vector.broadcast %63 : vector<8x1xf32> to vector<8x8xf32>
    %65 = arith.mulf %60, %64 : vector<8x8xf32>
    %66 = arith.truncf %65 : vector<8x8xf32> to vector<8x8xbf16>
    %67 = vector.extract_strided_slice %21 {offsets = [0, 8], sizes = [8, 8], strides = [1, 1]} : vector<8x32xbf16> to vector<8x8xbf16>
    %cst_23 = arith.constant dense<0.000000e+00> : vector<8x8xf32>
    %68 = tpu.matmul %66, %67, %cst_23 {dimension_numbers = #tpu.dot_dimension_numbers<[1], [0], [0], [1], [0, 0, 1, 1], [], []>} : vector<8x8xbf16>, vector<8x8xbf16>, vector<8x8xf32> -> vector<8x8xf32>
    %69 = arith.truncf %68 : vector<8x8xf32> to vector<8x8xbf16>
    %70 = vector.extract_strided_slice %25 {offsets = [8, 0], sizes = [8, 32], strides = [1, 1]} : vector<32x32xbf16> to vector<8x32xbf16>
    %cst_24 = arith.constant dense<0.000000e+00> : vector<8x32xf32>
    %71 = tpu.matmul %69, %70, %cst_24 {dimension_numbers = #tpu.dot_dimension_numbers<[1], [0], [0], [1], [0, 0, 1, 1], [], []>} : vector<8x8xbf16>, vector<8x32xbf16>, vector<8x32xf32> -> vector<8x32xf32>
    %72 = arith.addf %50, %71 : vector<8x32xf32>
    %73 = vector.extract_strided_slice %19 {offsets = [0, 16], sizes = [8, 8], strides = [1, 1]} : vector<8x32xbf16> to vector<8x8xbf16>
    %74 = vector.extract_strided_slice %20 {offsets = [0, 16], sizes = [8, 8], strides = [1, 1]} : vector<8x32xbf16> to vector<8x8xbf16>
    %cst_25 = arith.constant dense<0.000000e+00> : vector<8x8xf32>
    %75 = tpu.matmul %73, %74, %cst_25 {dimension_numbers = #tpu.dot_dimension_numbers<[1], [1], [0], [0], [0, 0, 1, 0], [], []>} : vector<8x8xbf16>, vector<8x8xbf16>, vector<8x8xf32> -> vector<8x8xf32>
    %cst_26 = arith.constant -1.000000e+30 : f32
    %76 = vector.broadcast %cst_26 : f32 to vector<8x8xf32>
    %77 = arith.select %24, %75, %76 : vector<8x8xi1>, vector<8x8xf32>
    %cst_27 = arith.constant dense<0xFF800000> : vector<8xf32>
    %78 = vector.multi_reduction <maximumf>, %77, %cst_27 [1] : vector<8x8xf32> to vector<8xf32>
    %79 = vector.shape_cast %78 : vector<8xf32> to vector<8x1xf32>
    %80 = vector.broadcast %79 : vector<8x1xf32> to vector<8x8xf32>
    %81 = arith.subf %77, %80 : vector<8x8xf32>
    %82 = math.exp %81 : vector<8x8xf32>
    %cst_28 = arith.constant dense<0.000000e+00> : vector<8xf32>
    %83 = vector.multi_reduction <add>, %82, %cst_28 [1] : vector<8x8xf32> to vector<8xf32>
    %84 = vector.shape_cast %83 : vector<8xf32> to vector<8x1xf32>
    %85 = tpu.reciprocal %84 {approx = true} : vector<8x1xf32> -> vector<8x1xf32>
    %86 = vector.broadcast %85 : vector<8x1xf32> to vector<8x8xf32>
    %87 = arith.mulf %82, %86 : vector<8x8xf32>
    %88 = arith.truncf %87 : vector<8x8xf32> to vector<8x8xbf16>
    %89 = vector.extract_strided_slice %21 {offsets = [0, 16], sizes = [8, 8], strides = [1, 1]} : vector<8x32xbf16> to vector<8x8xbf16>
    %cst_29 = arith.constant dense<0.000000e+00> : vector<8x8xf32>
    %90 = tpu.matmul %88, %89, %cst_29 {dimension_numbers = #tpu.dot_dimension_numbers<[1], [0], [0], [1], [0, 0, 1, 1], [], []>} : vector<8x8xbf16>, vector<8x8xbf16>, vector<8x8xf32> -> vector<8x8xf32>
    %91 = arith.truncf %90 : vector<8x8xf32> to vector<8x8xbf16>
    %92 = vector.extract_strided_slice %25 {offsets = [16, 0], sizes = [8, 32], strides = [1, 1]} : vector<32x32xbf16> to vector<8x32xbf16>
    %cst_30 = arith.constant dense<0.000000e+00> : vector<8x32xf32>
    %93 = tpu.matmul %91, %92, %cst_30 {dimension_numbers = #tpu.dot_dimension_numbers<[1], [0], [0], [1], [0, 0, 1, 1], [], []>} : vector<8x8xbf16>, vector<8x32xbf16>, vector<8x32xf32> -> vector<8x32xf32>
    %94 = arith.addf %72, %93 : vector<8x32xf32>
    %95 = vector.extract_strided_slice %19 {offsets = [0, 24], sizes = [8, 8], strides = [1, 1]} : vector<8x32xbf16> to vector<8x8xbf16>
    %96 = vector.extract_strided_slice %20 {offsets = [0, 24], sizes = [8, 8], strides = [1, 1]} : vector<8x32xbf16> to vector<8x8xbf16>
    %cst_31 = arith.constant dense<0.000000e+00> : vector<8x8xf32>
    %97 = tpu.matmul %95, %96, %cst_31 {dimension_numbers = #tpu.dot_dimension_numbers<[1], [1], [0], [0], [0, 0, 1, 0], [], []>} : vector<8x8xbf16>, vector<8x8xbf16>, vector<8x8xf32> -> vector<8x8xf32>
    %cst_32 = arith.constant -1.000000e+30 : f32
    %98 = vector.broadcast %cst_32 : f32 to vector<8x8xf32>
    %99 = arith.select %24, %97, %98 : vector<8x8xi1>, vector<8x8xf32>
    %cst_33 = arith.constant dense<0xFF800000> : vector<8xf32>
    %100 = vector.multi_reduction <maximumf>, %99, %cst_33 [1] : vector<8x8xf32> to vector<8xf32>
    %101 = vector.shape_cast %100 : vector<8xf32> to vector<8x1xf32>
    %102 = vector.broadcast %101 : vector<8x1xf32> to vector<8x8xf32>
    %103 = arith.subf %99, %102 : vector<8x8xf32>
    %104 = math.exp %103 : vector<8x8xf32>
    %cst_34 = arith.constant dense<0.000000e+00> : vector<8xf32>
    %105 = vector.multi_reduction <add>, %104, %cst_34 [1] : vector<8x8xf32> to vector<8xf32>
    %106 = vector.shape_cast %105 : vector<8xf32> to vector<8x1xf32>
    %107 = tpu.reciprocal %106 {approx = true} : vector<8x1xf32> -> vector<8x1xf32>
    %108 = vector.broadcast %107 : vector<8x1xf32> to vector<8x8xf32>
    %109 = arith.mulf %104, %108 : vector<8x8xf32>
    %110 = arith.truncf %109 : vector<8x8xf32> to vector<8x8xbf16>
    %111 = vector.extract_strided_slice %21 {offsets = [0, 24], sizes = [8, 8], strides = [1, 1]} : vector<8x32xbf16> to vector<8x8xbf16>
    %cst_35 = arith.constant dense<0.000000e+00> : vector<8x8xf32>
    %112 = tpu.matmul %110, %111, %cst_35 {dimension_numbers = #tpu.dot_dimension_numbers<[1], [0], [0], [1], [0, 0, 1, 1], [], []>} : vector<8x8xbf16>, vector<8x8xbf16>, vector<8x8xf32> -> vector<8x8xf32>
    %113 = arith.truncf %112 : vector<8x8xf32> to vector<8x8xbf16>
    %114 = vector.extract_strided_slice %25 {offsets = [24, 0], sizes = [8, 32], strides = [1, 1]} : vector<32x32xbf16> to vector<8x32xbf16>
    %cst_36 = arith.constant dense<0.000000e+00> : vector<8x32xf32>
    %115 = tpu.matmul %113, %114, %cst_36 {dimension_numbers = #tpu.dot_dimension_numbers<[1], [0], [0], [1], [0, 0, 1, 1], [], []>} : vector<8x8xbf16>, vector<8x32xbf16>, vector<8x32xf32> -> vector<8x32xf32>
    %116 = arith.addf %94, %115 : vector<8x32xf32>
    %c0_37 = arith.constant 0 : index
    %c0_38 = arith.constant 0 : index
    %c0_39 = arith.constant 0 : index
    %117 = vector.load %arg7[%c0_37, %c0_38, %c0_39] : memref<1x8x32xf32, #tpu.memory_space<vmem>>, vector<1x8x32xf32>
    %118 = vector.shape_cast %117 : vector<1x8x32xf32> to vector<8x32xf32>
    %119 = vector.shape_cast %116 : vector<8x32xf32> to vector<1x8x32xf32>
    tpu.vector_store %arg7[%c0_37, %c0_38, %c0_39], %119 {strides = array<i32>} : memref<1x8x32xf32, #tpu.memory_space<vmem>>, vector<1x8x32xf32>,
    return
  }
  func.func @transform_0(%arg0: i32) -> (i32, i32, i32) {
    %c0_i32 = arith.constant 0 : i32
    %c0_i32_0 = arith.constant 0 : i32
    %c0_i32_1 = arith.constant 0 : i32
    return %arg0, %c0_i32, %c0_i32_0 : i32, i32, i32
  }
  func.func @transform_1(%arg0: i32) -> (i32, i32) {
    %c0_i32 = arith.constant 0 : i32
    %c0_i32_0 = arith.constant 0 : i32
    %c0_i32_1 = arith.constant 0 : i32
    return %c0_i32, %c0_i32_0 : i32, i32
  }
  func.func @transform_2(%arg0: i32) -> (i32, i32) {
    %c0_i32 = arith.constant 0 : i32
    %c0_i32_0 = arith.constant 0 : i32
    %c0_i32_1 = arith.constant 0 : i32
    return %c0_i32, %c0_i32_0 : i32, i32
  }
  func.func @transform_3(%arg0: i32) -> (i32, i32) {
    %c0_i32 = arith.constant 0 : i32
    %c0_i32_0 = arith.constant 0 : i32
    %c0_i32_1 = arith.constant 0 : i32
    return %c0_i32, %c0_i32_0 : i32, i32
  }
  func.func @transform_4(%arg0: i32) -> (i32, i32) {
    %c0_i32 = arith.constant 0 : i32
    %c0_i32_0 = arith.constant 0 : i32
    %c0_i32_1 = arith.constant 0 : i32
    return %c0_i32, %c0_i32_0 : i32, i32
  }
  func.func @transform_5(%arg0: i32) -> (i32, i32) {
    %c0_i32 = arith.constant 0 : i32
    %c0_i32_0 = arith.constant 0 : i32
    %c0_i32_1 = arith.constant 0 : i32
    return %c0_i32, %c0_i32_0 : i32, i32
  }
  func.func @transform_6(%arg0: i32) -> (i32, i32, i32) {
    %c0_i32 = arith.constant 0 : i32
    %c0_i32_0 = arith.constant 0 : i32
    %c0_i32_1 = arith.constant 0 : i32
    return %arg0, %c0_i32, %c0_i32_0 : i32, i32, i32
  }
}

</mosaic_0001>

<bundles_post_ra>
// kernel: tile.14
= control target key start
LH: loop header
LB: loop body
LE: loop exit
PB: predicated region body
PF: predicated region fallthrough
CT: control target
= control target key end

     0   :  { %vm42_vm0 = vcmask 1047556   ;;  %vm44_vm1 = vcmask 64512   ;;  %s93_s22 = smov 8   ;;  %s94_s25 = smov 16   ;;  %vm54_vm2 = vcmask 261312   ;;  %vm64_vm3 = vcmask 195712   ;;  %s146_s0 = inlined_call_operand.vmem [shape: f32[8,4,8], index: 0, kind: input, shape index: {}]   ;;  %s147_s1 = inlined_call_operand.vmem [shape: f32[8,32], index: 1, kind: output, shape index: {}]  }
   0x1   :  { %v82_v0 = vld [vmem:[%s146_s0 + $0x1c] sm:$0xf]  ;;  %v83_v1 = vld [vmem:[%s146_s0 + $0x18] sm:$0xf]  ;;  %v84_v2 = vld [vmem:[%s146_s0 + $0x14] sm:$0xf] }
   0x2   :  { %8 = vst [vmem:[#allocation0 + $0x38] sm:$0xf] %v82_v0  ;;  %13 = vst [vmem:[#allocation0 + $0x30] sm:$0xf] %v83_v1  ;;  %v85_v3 = vld [vmem:[%s146_s0 + $0x10] sm:$0xf] }
   0x3   :  { %18 = vst [vmem:[#allocation0 + $0x28] sm:$0xf] %v84_v2  ;;  %v86_v4 = vld [vmem:[%s146_s0 + $0xc] sm:$0xf]  ;;  %v87_v5 = vld [vmem:[%s146_s0 + $0x8] sm:$0xf] }
   0x4   :  { %23 = vst [vmem:[#allocation0 + $0x20] sm:$0xf] %v85_v3  ;;  %28 = vst [vmem:[#allocation0 + $0x18] sm:$0xf] %v86_v4  ;;  %v88_v6 = vld [vmem:[%s146_s0 + $0x4] sm:$0xf] }
   0x5   :  { %33 = vst [vmem:[#allocation0 + $0x10] sm:$0xf] %v87_v5  ;;  %v38_v7 = vld [vmem:[%s146_s0] sm:$0xf]  ;;  %37 = vst [vmem:[#allocation0 + $0x8] sm:$0xf] %v88_v6 }
   0x6   :  { %39 = vst [vmem:[#allocation0] sm:$0xf] %v38_v7  ;;  %s92_s0 = smov 24   ;;  %vm74_vm4 = vcmask 130112  }
   0xb   :  { %v49_v8 = vld [vmem:[#allocation0 + $0x3] ss:$8 sm:$0xf0]   ;;  %v59_v9 = vld [vmem:[#allocation0 + $0x2] ss:$8 sm:$0xf0]  }
   0xc   :  { %v69_v14 = vld [vmem:[#allocation0 + $0x1] ss:$8 sm:$0xf0]   ;;  %v41_v17 = vld [vmem:[#allocation0] ss:$8 sm:$0xf0]  }
   0xd   :  { %v47_v10 = vld [vmem:[#allocation0 + $0x3] ss:$8 sm:$0xf]   ;;  %v57_v11 = vld [vmem:[#allocation0 + $0x2] ss:$8 sm:$0xf]  }
   0xe   :  { %v51_v12 = vsel %vm42_vm0, %v49_v8, %v47_v10  ;;  %v67_v13 = vld [vmem:[#allocation0 + $0x1] ss:$8 sm:$0xf]   ;;  %v40_v16 = vld [vmem:[#allocation0] ss:$8 sm:$0xf]   ;;  %v61_v18 = vsel %vm42_vm0, %v59_v9, %v57_v11 }
   0xf   :  { %52 = vrot.lane.b32.xlu0 %v51_v12, %s92_s0  ;;  %v71_v15 = vsel %vm42_vm0, %v69_v14, %v67_v13  ;;  %v43_v19 = vsel %vm42_vm0, %v41_v17, %v40_v16 }
  0x10   :  { %72 = vrot.lane.b32.xlu1 %v71_v15, %s93_s22  ;;  %45 = vst.msk [vmem:[%s147_s1] sm:$0xff] %vm44_vm1, %v43_v19  }
  0x13   :  { %62 = vrot.lane.b32.xlu0 %v61_v18, %s94_s25 }
  0x81   :  { %v53_v20 = vpop.permute.xlu0 %52  }
  0x82   :  { %55 = vst.msk [vmem:[%s147_s1] sm:$0xff] %vm54_vm2, %v53_v20   ;;  %v73_v21 = vpop.permute.xlu1 %72  }
  0x85   :  { %v63_v22 = vpop.permute.xlu0 %62  }
  0x86   :  { %65 = vst.msk [vmem:[%s147_s1] sm:$0xff] %vm64_vm3, %v63_v22  }
  0x87   :  { %75 = vst.msk [vmem:[%s147_s1] sm:$0xff] %vm74_vm4, %v73_v21  }

// kernel: multi_head_attention.1
= control target key start
LH: loop header
LB: loop body
LE: loop exit
PB: predicated region body
PF: predicated region fallthrough
CT: control target
= control target key end

     0   :  { %11 = vsyncpa [#allocation3], 0  ;;  %s1644_s0 = inlined_call_operand.vmem [shape: bf16[2,8,32], index: 0, kind: input, shape index: {}]   ;;  %s1645_s1 = inlined_call_operand.vmem [shape: bf16[32,160], index: 1, kind: input, shape index: {}]   ;;  %s1646_s2 = inlined_call_operand.vmem [shape: f32[8,32], index: 2, kind: input, shape index: {}]   ;;  %s1647_s3 = inlined_call_operand.vmem [shape: f32[8,32], index: 3, kind: input, shape index: {}]   ;;  %s1648_s4 = inlined_call_operand.vmem [shape: bf16[32,32], index: 4, kind: input, shape index: {}]   ;;  %s1649_s5 = inlined_call_operand.vmem [shape: f32[1,32], index: 5, kind: input, shape index: {}]   ;;  %s1650_s6 = inlined_call_operand.hbm [shape: f32[2,8,32], index: 6, kind: output, shape index: {}]  }
   0x1   :  { %13 = vsyncpa [#allocation3 + $0x1], 0  ;;  %s1403_s21 = smov 0   ;;  %s1405_s22 = smov 0  }
   0x2   :  { %s1407_s23 = smov 0   ;;  %s1409_s24 = smov 0  }
   0x3 LB: > { %s1424_s25 = sadd.s32 4294967295, %s1350_s24   ;;  %s1075_s26 = sadd.s32 4294967294, %s1350_s24   ;;  %s1350_s24 = sphi %s1409_s24, %s1656_s24   ;;  %s1346_s23 = sphi %s1407_s23, %s1655_s23   ;;  %s1342_s22 = sphi %s1405_s22, %s1654_s22   ;;  %s1338_s21 = sphi %s1403_s21, %s1653_s21  }
   0x4   : > { %s1428_s27 = sadd.s32 1, %s1350_s24   ;;  %s157_s28 = sadd.s32 1, %s1346_s23 }
   0x5   : > { %s154_s29 = ssub.s32 %s1350_s24, %s1428_s27  ;;  %p167_p0 = scmp.ne.s32.totalorder %s1346_s23, %s1342_s22 }
   0x6   : > { %p155_p1 = scmp.eq.s32.totalorder %s154_s29, 0  ;;  %p168_p2 = scmp.eq.s32.totalorder %s1424_s25, 1 }
   0x7   : > { %p173_p3 = scmp.ne.s32.totalorder %s1342_s22, %s1338_s21  ;;  %p174_p4 = scmp.eq.s32.totalorder %s1075_s26, 1 }
   0x8   : > { %s1439_s30 = scalar_select %p155_p1, %s1346_s23, %s157_s28  }
   0x9   : > { %p1441_p5 = por %p168_p2, %p167_p0  ;;  %p1445_p6 = por %p174_p4, %p173_p3 }
   0xa   : > { %p1078_p7 = scmp.ge.s32.totalorder %s1350_s24, 1  ;;  %p214_p8 = scmp.lt.s32.totalorder %s1350_s24, 3 }
   0xc   : > { %p215_p9 = pnand %p1078_p7, %p214_p8 }
   0xd   : > { %v1266_v0 = vld [vmem:[%s1645_s1 + $0x4] ss:$8 sps:$4 sm:$0xff] (!%p215_p9)   ;;  %p243_p10 = scmp.lt.s32.totalorder (!%p215_p9), %s1424_s25, 1  ;;  %v1268_v1 = vld [vmem:[%s1645_s1] ss:$8 sps:$4 sm:$0xff] (!%p215_p9)   ;;  %v1352_v2 = vmov (!%p215_p9), 0   ;;  %v346_v28 = vlaneseq (!%p215_p9) }
   0xe   : > { %218 = sbr.rel (%p215_p9) target bundleno = 2536 (0x9e8), region = 44  ;;  %309 = vmatprep.mubr.bf16.mxu0 (!%p215_p9), %v1352_v2  ;;  %277 = vmatprep.subr.bf16.mxu0 (!%p215_p9), %v1266_v0  ;;  %v1269_v3 = vld [vmem:[%s1645_s1 + $0x14] ss:$8 sps:$4 sm:$0xff] (!%p215_p9)   ;;  %v319_v4 = vld [vmem:[%s1647_s3] sm:$0xff] (!%p215_p9)  ;;  %v1271_v5 = vld [vmem:[%s1645_s1 + $0x10] ss:$8 sps:$4 sm:$0xff] (!%p215_p9)  }
   0xf   : > { %278 = vmatpush1.bf16.msra.mxu0 (!%p215_p9), %v1268_v1  ;;  %s1353_s20 = smov (!%p215_p9), 96   ;;  %v318_v6 = vld [vmem:[%s1646_s2] sm:$0xff] (!%p215_p9)  ;;  %s1354_s9 = smov (!%p215_p9), 32   ;;  %vm273_vm0 = vcmask (!%p215_p9), 261120   ;;  %v1355_v15 = vmov (!%p215_p9), 0.0   ;;  %vm1356_vm1 = vmmov (!%p215_p9), 0  }
  0x10   : > { %322 = vrot.lane.b32.xlu1 (!%p215_p9), %v319_v4, %s1353_s20  ;;  %279 = vmatprep.subr.bf16.mxu0 (!%p215_p9), %v1269_v3  ;;  %vm365_vm2 = vcmask (!%p215_p9), 64512   ;;  %v1494_v29 = vshrl.u32 (!%p215_p9), %v346_v28, 7  ;;  %v1496_v30 = vand.u32 (!%p215_p9), 127, %v346_v28  ;;  %s1357_s13 = smov (!%p215_p9), 88   ;;  %s1358_s14 = smov (!%p215_p9), 120   ;;  %vm431_vm4 = vcmask (!%p215_p9), 1043456  }
  0x11   : > { %332 = vrot.lane.b32.xlu0 (!%p215_p9), %v318_v6, %s1354_s9  ;;  %1127 = vmatprep.subr.bf16.mxu1 (!%p215_p9), %v1355_v15  ;;  %s1360_s16 = smov (!%p215_p9), 64   ;;  %s1361_s17 = smov (!%p215_p9), 80   ;;  %v351_v55 = vld [vmem:[%s1648_s4] sm:$0xf] (!%p215_p9) }
  0x12   : > { %1129 = vmatprep.mubr.msk.bf16.mxu1 (!%p215_p9), %vm1356_vm1, %v1355_v15  ;;  %vm350_vm3 = vcmp.le.s32.totalorder (!%p215_p9), %v1496_v30, %v1494_v29  ;;  %v480_v56 = vsel (!%p215_p9), %vm431_vm4, %v351_v55, 0  ;;  %s1363_s26 = smov (!%p215_p9), 104   ;;  %s1364_s28 = smov (!%p215_p9), 72  }
  0x13   : > { %280 = vmatpush1.bf16.msra.mxu0 (!%p215_p9), %v1271_v5  ;;  %s1366_s11 = smov (!%p215_p9), 40  }
  0x14   : > { %1133 = vmatprep.subr.bf16.mxu0 (!%p215_p9), %v1355_v15 }
  0x15   : > { %s244_s15 = scalar_select %p243_p10, %s1424_s25, 1 }
  0x17   : > { %s1080_s29 = sshll.u32 %s244_s15, 2  ;;  %s1359_s15 = smov 112  }
  0x18   : > { %s246_s12 = scalar_lea.vmem %s1644_s0, %s1080_s29  ;;  %s1365_s29 = smov 56  }
  0x19   : > { %v248_v7 = vld [vmem:[%s246_s12] sm:$0xf]  ;;  %s1367_s12 = smov [#allocation2]  }
  0x1a   : > { %1085 = vmatmul.mubr.msk.bf16.vlgmr.msra.gmra.mrb[0].mxu0 %vm273_vm0, %v248_v7 }
  0x1b   : > { %1135 = vmatprep.mubr.msk.bf16.mxu0 %vm1356_vm1, %v1355_v15 }
  0x82   : > { %v323_v12 = vpop.permute.xlu1 %322 }
  0x83   : > { %v333_v16 = vpop.permute.xlu0 %332 }
  0xed   : > { %v311_v8 = vpop.f32.mrb[0].mxu0 }
  0xee   : > { %v313_v9 = vpop.f32.mrb[1].mxu0  ;;  %v325_v14 = vmul.f32 %v323_v12, %v311_v8  ;;  %v335_v17 = vmul.f32 %v333_v16, %v311_v8  ;;  %v320_v22 = vmul.f32 %v318_v6, %v311_v8  ;;  %v1508_v42 = vpack.c.bf16 %v311_v8, %v311_v8 }
  0xef   : > { %v336_v10 = vmul.f32 %v319_v4, %v313_v9  ;;  %v315_v11 = vpop.f32.mrb[2].mxu0 }
  0xf0   : > { %v316_v13 = vpop.f32.mrb[3].mxu0 }
  0xf1   : > { %338 = vrot.lane.b32.xlu0 %v336_v10, %s1354_s9 }
  0xf5   : > { %327 = vrot.lane.b32.xlu0 %v325_v14, %s1354_s9 }
 0x163   : > { %v339_v18 = vpop.permute.xlu0 %338 }
 0x164   : > { %v341_v19 = vadd.f32 %v339_v18, %v335_v17 }
 0x166   : > { %v1482_v20 = vpack.c.bf16 %v341_v19, %v341_v19 }
 0x167   : > { %v328_v21 = vpop.permute.xlu0 %327 }
 0x168   : > { %363 = vrot.lane.b32.xlu1 %v1482_v20, %s1353_s20  ;;  %v330_v23 = vadd.f32 %v328_v21, %v320_v22  ;;  %s1362_s20 = smov 48  }
 0x16a   : > { %v342_v26 = vmul.f32 0.35355338, %v330_v23 }
 0x16c   : > { %v1488_v27 = vpack.c.bf16 %v342_v26, %v342_v26 }
 0x1da   : > { %v364_v24 = vpop.permute.xlu1 %363 }
 0x1db   : > { %v370_v25 = vsel %vm365_vm2, %v364_v24, 0 }
 0x1dc   : > { %1128 = vmatpush3.bf16.xpose.msra.mxu1 %v370_v25 }
 0x1dd   : > { %1139 = vmatprep.subr.bf16.mxu1 %v1355_v15 }
 0x1e3   : > { %1130 = vmatmul.mubr.msk.bf16.vlgmr.msra.gmra.mrb[0].mxu1 %vm365_vm2, %v1488_v27 }
 0x1e4   : > { %1141 = vmatprep.mubr.msk.bf16.mxu1 %vm1356_vm1, %v1355_v15  ;;  %1140 = vmatpush3.bf16.msra.mxu1 %v480_v56 }
 0x1e5   : > { %1151 = vmatprep.subr.bf16.mxu1 %v1355_v15 }
 0x2b6   : > { %v406_v31 = vpop.f32.mrb[0].mxu1 }
 0x2b7   : > { %v412_v32 = vsel %vm350_vm3, %v406_v31, -1e+30  ;;  %v1131_v33 = vpop.f32.mrb[1].mxu1 }
 0x2b8   : > { %v409_v34 = vpop.f32.mrb[2].mxu1  ;;  %v413_v35 = vsel %vm365_vm2, %v412_v32, -inf }
 0x2b9   : > { %414 = vmax.xlane.f32.xlu1 %v413_v35  ;;  %v1132_v36 = vpop.f32.mrb[3].mxu1 }
 0x2ca   : > { %526 = vrot.lane.b32.xlu1 %v1482_v20, %s1357_s13  ;;  %s1292_s13 = sshll.u32 %s1367_s12, 4  ;;  %s1293_s13 = int_to_ptr.vmem [resolvable:$false] %s1292_s13 }
 0x2ce   : > { %524 = vrot.lane.b32.xlu1 %v1488_v27, %s1358_s14  ;;  %s1294_s14 = scalar_lea.vmem %s1293_s13, 256 }
 0x2d2   : > { %683 = vrot.lane.b32.xlu1 %v1488_v27, %s1359_s15 }
 0x346   : > { %v415_v37 = vpop.xlane.xlu1 %414 }
 0x347   : > { %v416_v38 = vsub.f32 %v412_v32, %v415_v37 }
 0x349   : > { %v417_v39 = vmul.f32 1.442695, %v416_v38 }
 0x34a   : > { %v527_v48 = vpop.permute.xlu1 %526 }
 0x34b   : > { %1272 = vpow2.f32 %v417_v39  ;;  %v532_v50 = vsel %vm365_vm2, %v527_v48, 0 }
 0x34e   : > { %v525_v52 = vpop.permute.xlu1 %524 }
 0x352   : > { %v684_v54 = vpop.permute.xlu1 %683 }
 0x355   : > { %v1273_v40 = vpop.eup %1272 }
 0x356   : > { %v419_v41 = vsel %vm365_vm2, %v1273_v40, 0.0 }
 0x357   : > { %420 = vadd.xlane.f32.xlu0 %v419_v41 }
 0x36d   : > { %426 = vrot.lane.b32.xlu0 %v1508_v42, %s1360_s16  ;;  %s240_s16 = sand.u32 1, %s1342_s22  }
 0x371   : > { %685 = vrot.lane.b32.xlu0 %v1482_v20, %s1361_s17  ;;  %s1079_s17 = sshll.u32 %s240_s16, 3 }
 0x3e4   : > { %v421_v43 = vpop.xlane.xlu0 %420 }
 0x3e5   : > { %1274 = vrcp.f32 %v421_v43 }
 0x3e8   : > { %v427_v44 = vpop.permute.xlu0 %426 }
 0x3e9   : > { %v433_v45 = vsel %vm431_vm4, %v427_v44, 0 }
 0x3ea   : > { %1134 = vmatpush3.bf16.msra.mxu0 %v433_v45 }
 0x3eb   : > { %1145 = vmatprep.subr.bf16.mxu0 %v1355_v15 }
 0x3ec   : > { %v686_v51 = vpop.permute.xlu0 %685 }
 0x3ed   : > { %v691_v53 = vsel %vm365_vm2, %v686_v51, 0 }
 0x3ef   : > { %v1275_v46 = vpop.eup %1274 }
 0x3f0   : > { %v423_v47 = vmul.f32 %v1275_v46, %v1273_v40 }
 0x3f2   : > { %v424_v49 = vpack.c.bf16 %v423_v47, %v423_v47 }
 0x3f4   : > { %1136 = vmatmul.mubr.msk.bf16.vlgmr.msra.gmra.mrb[4].mxu0 %vm365_vm2, %v424_v49  ;;  %v352_v49 = vld [vmem:[%s1648_s4 + $0x4] sm:$0xf] }
 0x3f5   : > { %1146 = vmatpush3.bf16.xpose.msra.mxu0 %v532_v50  ;;  %1147 = vmatprep.mubr.msk.bf16.mxu0 %vm1356_vm1, %v1355_v15  ;;  %v640_v50 = vsel %vm431_vm4, %v352_v49, 0 }
 0x3f6   : > { %1163 = vmatprep.subr.bf16.mxu0 %v1355_v15 }
 0x3fc   : > { %1148 = vmatmul.mubr.msk.bf16.vlgmr.msra.gmra.mrb[8].mxu0 %vm365_vm2, %v525_v52 }
 0x3fd   : > { %1164 = vmatpush3.bf16.xpose.msra.mxu0 %v691_v53  ;;  %1165 = vmatprep.mubr.msk.bf16.mxu0 %vm1356_vm1, %v1355_v15 }
 0x3fe   : > { %1169 = vmatprep.subr.bf16.mxu0 %v1355_v15 }
 0x404   : > { %1166 = vmatmul.mubr.msk.bf16.vlgmr.msra.gmra.mrb[12].mxu0 %vm365_vm2, %v684_v54  ;;  %v353_v54 = vld [vmem:[%s1648_s4 + $0x8] sm:$0xf] }
 0x405   : > { %1171 = vmatprep.mubr.msk.bf16.mxu0 %vm1356_vm1, %v1355_v15 }
 0x4c7   : > { %v469_v57 = vpop.f32.mrb[4].mxu0 }
 0x4c8   : > { %v475_v58 = vpack.c.bf16 %v469_v57, %v469_v57  ;;  %v1137_v59 = vpop.f32.mrb[5].mxu0 }
 0x4c9   : > { %v472_v60 = vpop.f32.mrb[6].mxu0 }
 0x4ca   : > { %v1138_v61 = vpop.f32.mrb[7].mxu0  ;;  %1142 = vmatmul.mubr.msk.bf16.vlgmr.msra.gmra.mrb[4].mxu1 %vm365_vm2, %v475_v58  ;;  %v799_v58 = vsel %vm431_vm4, %v353_v54, 0 }
 0x4cb   : > { %1153 = vmatprep.mubr.msk.bf16.mxu1 %vm1356_vm1, %v1355_v15 }
 0x4cf   : > { %v568_v62 = vpop.f32.mrb[8].mxu0 }
 0x4d0   : > { %v1149_v63 = vpop.f32.mrb[9].mxu0  ;;  %v574_v16 = vsel %vm350_vm3, %v568_v62, -1e+30 }
 0x4d1   : > { %v571_v0 = vpop.f32.mrb[10].mxu0  ;;  %v575_v17 = vsel %vm365_vm2, %v574_v16, -inf }
 0x4d2   : > { %v1150_v1 = vpop.f32.mrb[11].mxu0 }
 0x4d3   : > { %v354_v1 = vld [vmem:[%s1648_s4 + $0xc] sm:$0xf] }
 0x4d7   : > { %v727_v2 = vpop.f32.mrb[12].mxu0 }
 0x4d8   : > { %v733_v3 = vsel %vm350_vm3, %v727_v2, -1e+30  ;;  %v1167_v4 = vpop.f32.mrb[13].mxu0 }
 0x4d9   : > { %v730_v5 = vpop.f32.mrb[14].mxu0  ;;  %v734_v6 = vsel %vm365_vm2, %v733_v3, -inf  ;;  %v958_v4 = vsel %vm431_vm4, %v354_v1, 0 }
 0x4da   : > { %735 = vmax.xlane.f32.xlu0 %v734_v6  ;;  %v1168_v7 = vpop.f32.mrb[15].mxu0 }
 0x4f0   : > { %746 = vrot.lane.b32.xlu0 %v1508_v42, %s1362_s20  ;;  %s1100_s20 = sshll.u32 %s1424_s25, 7  ;;  %s1003_s25 = scalar_lea.sflag [#allocation3], %s240_s16 }
 0x4f1   : > { %s1601_s10 = scalar_lea.hbm %s1650_s6, %s1100_s20 }
 0x4f4   : > { %842 = vrot.lane.b32.xlu0 %v1488_v27, %s1363_s26  ;;  %s242_s26 = scalar_lea.vmem [#allocation2], %s1079_s17 }
 0x567   : > { %v736_v8 = vpop.xlane.xlu0 %735 }
 0x568   : > { %v737_v9 = vsub.f32 %v733_v3, %v736_v8 }
 0x56a   : > { %v738_v10 = vmul.f32 1.442695, %v737_v9 }
 0x56b   : > { %v747_v11 = vpop.permute.xlu0 %746 }
 0x56c   : > { %1276 = vpow2.f32 %v738_v10  ;;  %v752_v12 = vsel %vm431_vm4, %v747_v11, 0  ;;  %v1086_v10 = vld [vmem:[%s1649_s5] ss:$0 sm:$0xff] }
 0x56d   : > { %1170 = vmatpush3.bf16.msra.mxu0 %v752_v12 }
 0x56e   : > { %1181 = vmatprep.subr.bf16.mxu0 %v1355_v15 }
 0x576   : > { %v1277_v13 = vpop.eup %1276 }
 0x577   : > { %v740_v14 = vsel %vm365_vm2, %v1277_v13, 0.0 }
 0x578   : > { %741 = vadd.xlane.f32.xlu1 %v740_v14 }
 0x589   : > { %844 = vrot.lane.b32.xlu1 %v1482_v20, %s1364_s28  ;;  %v843_v20 = vpop.permute.xlu0 %842  ;;  %s1016_s28 = sshll.u32 %s242_s26, 4  ;;  %s1603_s28 = int_to_ptr.vmem [resolvable:$true] %s1016_s28 }
 0x58a   : > { %p1295_p0 = scmp.lt.s32.totalorder %s1603_s28, %s1293_s13 }
 0x5ad   : > { %576 = vmax.xlane.f32.xlu1 %v575_v17 }
 0x605   : > { %v742_v18 = vpop.xlane.xlu1 %741 }
 0x606   : > { %1278 = vrcp.f32 %v742_v18 }
 0x609   : > { %v845_v22 = vpop.permute.xlu1 %844 }
 0x60a   : > { %v850_v24 = vsel %vm365_vm2, %v845_v22, 0 }
 0x610   : > { %v1279_v19 = vpop.eup %1278 }
 0x611   : > { %v744_v21 = vmul.f32 %v1279_v19, %v1277_v13 }
 0x613   : > { %v745_v23 = vpack.c.bf16 %v744_v21, %v744_v21 }
 0x615   : > { %1172 = vmatmul.mubr.msk.bf16.vlgmr.msra.gmra.mrb[16].mxu0 %vm365_vm2, %v745_v23 }
 0x616   : > { %1182 = vmatpush3.bf16.xpose.msra.mxu0 %v850_v24  ;;  %1183 = vmatprep.mubr.msk.bf16.mxu0 %vm1356_vm1, %v1355_v15 }
 0x61d   : > { %1184 = vmatmul.mubr.msk.bf16.vlgmr.msra.gmra.mrb[20].mxu0 %vm365_vm2, %v843_v20 }
 0x63a   : > { %v577_v25 = vpop.xlane.xlu1 %576 }
 0x63b   : > { %v578_v26 = vsub.f32 %v574_v16, %v577_v25 }
 0x63d   : > { %v579_v27 = vmul.f32 1.442695, %v578_v26 }
 0x63f   : > { %1280 = vpow2.f32 %v579_v27 }
 0x649   : > { %v1281_v28 = vpop.eup %1280 }
 0x64a   : > { %v581_v31 = vsel %vm365_vm2, %v1281_v28, 0.0 }
 0x64b   : > { %582 = vadd.xlane.f32.xlu0 %v581_v31 }
 0x661   : > { %587 = vrot.lane.b32.xlu0 %v1508_v42, %s1365_s29 }
 0x6d8   : > { %v583_v32 = vpop.xlane.xlu0 %582 }
 0x6d9   : > { %1282 = vrcp.f32 %v583_v32 }
 0x6dc   : > { %v588_v33 = vpop.permute.xlu0 %587 }
 0x6dd   : > { %v593_v34 = vsel %vm431_vm4, %v588_v33, 0 }
 0x6de   : > { %1152 = vmatpush3.bf16.msra.mxu1 %v593_v34 }
 0x6df   : > { %1157 = vmatprep.subr.bf16.mxu1 %v1355_v15 }
 0x6e3   : > { %v1283_v35 = vpop.eup %1282 }
 0x6e4   : > { %v585_v36 = vmul.f32 %v1283_v35, %v1281_v28 }
 0x6e6   : > { %v586_v37 = vpack.c.bf16 %v585_v36, %v585_v36 }
 0x6e8   : > { %1154 = vmatmul.mubr.msk.bf16.vlgmr.msra.gmra.mrb[8].mxu1 %vm365_vm2, %v586_v37  ;;  %v788_v38 = vpop.f32.mrb[16].mxu0 }
 0x6e9   : > { %v1173_v39 = vpop.f32.mrb[17].mxu0  ;;  %1159 = vmatprep.mubr.msk.bf16.mxu1 %vm1356_vm1, %v1355_v15  ;;  %1158 = vmatpush3.bf16.msra.mxu1 %v640_v50 }
 0x6ea   : > { %v791_v40 = vpop.f32.mrb[18].mxu0  ;;  %1175 = vmatprep.subr.bf16.mxu1 %v1355_v15 }
 0x6eb   : > { %v1174_v41 = vpop.f32.mrb[19].mxu0 }
 0x6f0   : > { %v886_v43 = vpop.f32.mrb[20].mxu0 }
 0x6f1   : > { %v892_v44 = vsel %vm350_vm3, %v886_v43, -1e+30  ;;  %v1185_v45 = vpop.f32.mrb[21].mxu0 }
 0x6f2   : > { %v889_v46 = vpop.f32.mrb[22].mxu0  ;;  %v893_v47 = vsel %vm365_vm2, %v892_v44, -inf }
 0x6f3   : > { %894 = vmax.xlane.f32.xlu1 %v893_v47  ;;  %v1186_v48 = vpop.f32.mrb[23].mxu0 }
 0x780   : > { %v895_v51 = vpop.xlane.xlu1 %894 }
 0x781   : > { %v896_v52 = vsub.f32 %v892_v44, %v895_v51 }
 0x783   : > { %v897_v53 = vmul.f32 1.442695, %v896_v52 }
 0x785   : > { %1284 = vpow2.f32 %v897_v53 }
 0x78f   : > { %v1285_v29 = vpop.eup %1284 }
 0x790   : > { %v899_v30 = vsel %vm365_vm2, %v1285_v29, 0.0 }
 0x791   : > { %900 = vadd.xlane.f32.xlu1 %v899_v30 }
 0x7a2   : > { %905 = vrot.lane.b32.xlu1 %v1508_v42, %s1366_s11  ;;  %v794_v42 = vpack.c.bf16 %v788_v38, %v788_v38  ;;  %s1288_s11 = scalar_lea.vmem %s1603_s28, 128 }
 0x7a3   : > { %p1289_p11 = scmp.ne.s32.totalorder %s1603_s28, %s1288_s11  ;;  %p1296_p1 = scmp.lt.s32.totalorder %s1294_s14, %s1288_s11 }
 0x7a5   : > { %p1290_p12 = pnand %p1289_p11, %p1441_p5  ;;  %p1297_p2 = por %p1296_p1, %p1295_p0 }
 0x7a7   : > { %p1291_p13 = pneg %p1290_p12 }
 0x7a9   : > { %p1298_p3 = pnand %p1297_p2, %p1291_p13 }
 0x7bb   : > { %v629_v55 = vpop.f32.mrb[8].mxu1 }
 0x7bc   : > { %v635_v56 = vpack.c.bf16 %v629_v55, %v629_v55  ;;  %v1155_v57 = vpop.f32.mrb[9].mxu1 }
 0x7bd   : > { %v632_v59 = vpop.f32.mrb[10].mxu1 }
 0x7be   : > { %v1156_v60 = vpop.f32.mrb[11].mxu1  ;;  %1160 = vmatmul.mubr.msk.bf16.vlgmr.msra.gmra.mrb[4].mxu1 %vm365_vm2, %v635_v56 }
 0x7bf   : > { %1176 = vmatpush3.bf16.msra.mxu1 %v799_v58  ;;  %1177 = vmatprep.mubr.msk.bf16.mxu1 %vm1356_vm1, %v1355_v15 }
 0x7c0   : > { %1187 = vmatprep.subr.bf16.mxu1 %v1355_v15 }
 0x7ca   : > { %1178 = vmatmul.mubr.msk.bf16.vlgmr.msra.gmra.mrb[4].mxu1 %vm365_vm2, %v794_v42 }
 0x7cb   : > { %1189 = vmatprep.mubr.msk.bf16.mxu1 %vm1356_vm1, %v1355_v15 }
 0x81e   : > { %v901_v61 = vpop.xlane.xlu1 %900 }
 0x81f   : > { %1286 = vrcp.f32 %v901_v61 }
 0x822   : > { %v906_v62 = vpop.permute.xlu1 %905 }
 0x823   : > { %v911_v63 = vsel %vm431_vm4, %v906_v62, 0 }
 0x824   : > { %1188 = vmatpush3.bf16.msra.mxu1 %v911_v63 }
 0x825   : > { %1193 = vmatprep.subr.bf16.mxu1 %v1355_v15 }
 0x829   : > { %v1287_v0 = vpop.eup %1286 }
 0x82a   : > { %v903_v2 = vmul.f32 %v1287_v0, %v1285_v29 }
 0x82c   : > { %v904_v3 = vpack.c.bf16 %v903_v2, %v903_v2 }
 0x82e   : > { %1190 = vmatmul.mubr.msk.bf16.vlgmr.msra.gmra.mrb[12].mxu1 %vm365_vm2, %v904_v3 }
 0x82f   : > { %1194 = vmatpush3.bf16.msra.mxu1 %v958_v4  ;;  %1195 = vmatprep.mubr.msk.bf16.mxu1 %vm1356_vm1, %v1355_v15 }
 0x901   : > { %v947_v5 = vpop.f32.mrb[12].mxu1 }
 0x902   : > { %v953_v6 = vpack.c.bf16 %v947_v5, %v947_v5  ;;  %v1191_v7 = vpop.f32.mrb[13].mxu1 }
 0x903   : > { %v950_v8 = vpop.f32.mrb[14].mxu1 }
 0x904   : > { %v1192_v9 = vpop.f32.mrb[15].mxu1  ;;  %1196 = vmatmul.mubr.msk.bf16.vlgmr.msra.gmra.mrb[4].mxu1 %vm365_vm2, %v953_v6 }
 0x9d7   : > { %v994_v11 = vpop.f32.mrb[4].mxu1 }
 0x9d8   : > { %v1199_v12 = vadd.f32 %v1086_v10, %v994_v11  ;;  %v1197_v15 = vpop.f32.mrb[5].mxu1 }
 0x9d9   : > { %v997_v13 = vpop.f32.mrb[6].mxu1 }
 0x9da   : > { %v1198_v14 = vpop.f32.mrb[7].mxu1  ;;  %1001 = vst.msk [vmem:[%s242_s26] sm:$0xff] %vm273_vm0, %v1199_v12 }
 0x9db   : > { %1301 = shalt.err (!%p1298_p3)
}
 0x9dc   : > { %s1302_s15 = scalar_lea.hbm %s1601_s10, 128  ;;  %s1306_s18 = scalar_lea.hbm %s1650_s6, 256 }
 0x9dd   : > { %p1303_p4 = scmp.ne.s32.totalorder %s1601_s10, %s1302_s15  ;;  %p1307_p9 = scmp.lt.u32.totalorder %s1601_s10, %s1650_s6 }
 0x9de   : > { %p1308_p10 = scmp.lt.u32.totalorder %s1306_s18, %s1302_s15  ;;  %p1310_p12 = scmp.lt.u32.totalorder %s1302_s15, %s1601_s10 }
 0x9df   : > { %p1304_p7 = pnand %p1303_p4, %p1441_p5 }
 0x9e0   : > { %p1309_p11 = por %p1308_p10, %p1307_p9 }
 0x9e1   : > { %p1305_p8 = pneg %p1304_p7 }
 0x9e2   : > { %p1311_p13 = por %p1310_p12, %p1309_p11 }
 0x9e4   : > { %p1312_p0 = pnand %p1311_p13, %p1305_p8 }
 0x9e6   : > { %1315 = shalt.err (!%p1312_p0)
}
 0x9e7   : > { %1212 = dma.vmem_to_hbm [thread:$0]  (%p1441_p5), %s1603_s28, 128, %s1601_s10, %s1003_s25  }
 0x9e8 PF: > { %p1218_p1 = scmp.ge.s32.totalorder %s1350_s24, 2  ;;  %s1028_s26 = sand.u32 1, %s1338_s21  }
 0x9e9   : > { %s1029_s29 = scalar_lea.sflag [#allocation3], %s1028_s26 }
 0x9ea   : > { %p1215_p2 = pnand %p1218_p1, %p1445_p6 }
 0x9ec   : > { %1333 = dma.done.wait (!%p1215_p2), %s1029_s29, 128  }
 0x9ed   : > { %1335 = vsyncadd (!%p1215_p2), %s1029_s29, 4294967168  ;;  %p16_p3 = scmp.ge.s32.totalorder %s1428_s27, 4   ;;  %s1653_s21 = smov %s1342_s22 }
 0x9ee   : > { %s1654_s22 = smov %s1346_s23  ;;  %s1655_s23 = smov %s1439_s30 }
 0x9ef   : > { %s1656_s24 = smov %s1428_s27  ;;  %18 = sbr.rel (!%p16_p3) target bundleno = 3 (0x3), region = 79 }
 0x9f6   :  { %1034 = vsyncpa [#allocation3], 1 }
 0x9f7   :  { %1036 = vsyncpa [#allocation3 + $0x1], 1 }

</bundles_post_ra>
